<compile_context>
chip_gen: v7x
topology: tpu7x:2x2x1
jax: 0.10.0
libtpu: 0.0.40
codegen_flags: <defaults>
</compile_context>

<pallas_src>
import functools

import jax
import jax.numpy as jnp
from jax.experimental import pallas as pl
from jax.experimental.pallas import tpu as pltpu


def _moving_avg_kernel(x_ref, o_ref, xp_ref, *, kernel_size, stride, l_out,
                       pad_front, pad_end):
    """One (batch, channel-tile) block of the natural-layout problem.

    x_ref : (1, L, Ct)        input block (sequence x channel tile)
    o_ref : (1, out_len, Ct)  pooled + repeat-interleaved output block
    xp_ref: (Lp, Ct)          VMEM scratch (input dtype) for the padded sequence
    """
    _, L, Ct = x_ref.shape
    x = x_ref[0]                                            # (L, Ct), input dtype

    # --- Replicate padding built in VMEM (no padded HBM copy) ----------------
    xp_ref[pad_front:pad_front + L, :] = x
    if pad_front:
        xp_ref[0:pad_front, :] = jnp.broadcast_to(x[0:1, :], (pad_front, Ct))
    if pad_end:
        xp_ref[pad_front + L:pad_front + L + pad_end, :] = jnp.broadcast_to(
            x[L - 1:L, :], (pad_end, Ct))

    # --- Vectorized AvgPool1d: k strided sublane loads + f32 VPU adds --------
    def _tap(t):
        if stride == 1:
            return xp_ref[pl.ds(t, l_out), :]
        return xp_ref[pl.ds(t, l_out, stride=stride), :]

    acc = _tap(0).astype(jnp.float32)
    for t in range(1, kernel_size):
        acc = acc + _tap(t).astype(jnp.float32)
    # Cast to output dtype BEFORE the repeat broadcast (smaller live temporary).
    pooled = (acc * (1.0 / float(kernel_size))).astype(o_ref.dtype)  # (l_out, Ct)

    # --- repeat_interleave(stride) fused into a single dense store -----------
    if stride > 1:
        rep = jnp.broadcast_to(pooled[:, None, :], (l_out, stride, Ct))
        rep = rep.reshape(l_out * stride, Ct)
    else:
        rep = pooled
    o_ref[0] = rep


def _pick_channel_tile(B, C, L, Lp, l_out, out_len, itemsize):
    """Channel (lane) tile width, sized against a ~20 MiB VMEM budget."""
    # Per-lane-column VMEM bytes per grid step:
    #   2x double-buffered input block   : 2 * L       * itemsize
    #   2x double-buffered output block  : 2 * out_len * itemsize
    #   padded scratch (input dtype)     : Lp          * itemsize
    #   repeat-interleave temporary      : out_len     * itemsize
    #   f32 accumulator + ~2 live strided-tap temps : 3 * l_out * 4
    per_lane = itemsize * (2 * L + 3 * out_len + Lp) + 12 * l_out
    budget = 20 * 1024 * 1024
    ct = max(128, (budget // max(per_lane, 1) // 128) * 128)
    if ct >= C:
        ct = C  # one full-channel block (block dim == array dim is always legal)
        if B == 1 and C >= 256:
            # Force >= 2 grid steps so v7x megacore can use both TensorCores.
            ct = ((pl.cdiv(C, 2) + 127) // 128) * 128
    return ct


def moving_avg(x, kernel_size, stride):
    """JAX wrapper: natural (B, L, C) layout, grid over (batch, channel tiles)."""
    B, L, C = x.shape
    pad_front = kernel_size // 2
    pad_end = (kernel_size - 1) // 2
    Lp = L + pad_front + pad_end
    l_out = (Lp - kernel_size) // stride + 1
    out_len = l_out * stride

    itemsize = jnp.dtype(x.dtype).itemsize
    Ct = _pick_channel_tile(B, C, L, Lp, l_out, out_len, itemsize)
    # TODO(synk): for B == 1 and C <= 128 the grid has a single step; a
    # sequence-halo tiling axis would be needed to occupy both v7x TensorCores.
    grid = (B, pl.cdiv(C, Ct))

    kernel = functools.partial(
        _moving_avg_kernel,
        kernel_size=kernel_size, stride=stride, l_out=l_out,
        pad_front=pad_front, pad_end=pad_end)

    return pl.pallas_call(
        kernel,
        out_shape=jax.ShapeDtypeStruct((B, out_len, C), x.dtype),
        grid=grid,
        in_specs=[pl.BlockSpec((1, L, Ct), lambda b, c: (b, 0, c))],
        out_specs=pl.BlockSpec((1, out_len, Ct), lambda b, c: (b, 0, c)),
        scratch_shapes=[pltpu.VMEM((Lp, Ct), x.dtype)],
        compiler_params=pltpu.CompilerParams(
            dimension_semantics=("parallel", "parallel"),
            vmem_limit_bytes=32 * 1024 * 1024),
    )(x)


def moving_avg_ref(x, kernel_size, stride):
    """Pure-JAX reference mirroring the PyTorch forward exactly."""
    front = jnp.repeat(x[:, :1, :], kernel_size // 2, axis=1)
    end = jnp.repeat(x[:, -1:, :], (kernel_size - 1) // 2, axis=1)
    xp = jnp.concatenate([front, x, end], axis=1)
    Lp = xp.shape[1]
    l_out = (Lp - kernel_size) // stride + 1
    pooled = jnp.stack(
        [xp[:, j * stride: j * stride + kernel_size, :].mean(axis=1)
         for j in range(l_out)], axis=1)                      # (B, l_out, C)
    return jnp.repeat(pooled, stride, axis=1)                 # (B, l_out*s, C)


if __name__ == "__main__":
    key = jax.random.PRNGKey(0)

    # 1) Primary small config matching typical time-series usage.
    B, L, C = 2, 16, 8
    kernel_size, stride = 5, 2
    x = jax.random.normal(key, (B, L, C), dtype=jnp.float32)
    out = jax.block_until_ready(moving_avg(x, kernel_size, stride))
    ref = moving_avg_ref(x, kernel_size, stride)
    assert out.shape == ref.shape, (out.shape, ref.shape)
    assert jnp.allclose(out, ref, atol=1e-5, rtol=1e-5), "mismatch vs reference"

    # 2) stride=1 path, multi-batch grid.
    x2 = jax.random.normal(jax.random.PRNGKey(1), (4, 32, 64), dtype=jnp.float32)
    out2 = jax.block_until_ready(moving_avg(x2, 3, 1))
    ref2 = moving_avg_ref(x2, 3, 1)
    assert out2.shape == ref2.shape, (out2.shape, ref2.shape)
    assert jnp.allclose(out2, ref2, atol=1e-5, rtol=1e-5), "mismatch vs reference (cfg2)"

    # 3) B==1 forced channel split (>=2 grid steps), partial last channel tile,
    #    even kernel_size.
    x3 = jax.random.normal(jax.random.PRNGKey(2), (1, 16, 300), dtype=jnp.float32)
    out3 = jax.block_until_ready(moving_avg(x3, 4, 2))
    ref3 = moving_avg_ref(x3, 4, 2)
    assert out3.shape == ref3.shape, (out3.shape, ref3.shape)
    assert jnp.allclose(out3, ref3, atol=1e-5, rtol=1e-5), "mismatch vs reference (cfg3)"

    print("KERNEL_OK")
</pallas_src>

<mosaic_0001>
module attributes {stable_mosaic.version = 11 : i64} {
  func.func @_moving_avg_kernel(%arg0: i32, %arg1: i32, %arg2: memref<1x16x8xf32, #tpu.memory_space<vmem>>, %arg3: memref<1x16x8xf32, #tpu.memory_space<vmem>>, %arg4: memref<20x8xf32, #tpu.memory_space<vmem>>) attributes {dimension_semantics = [#tpu.dimension_semantics<parallel>, #tpu.dimension_semantics<parallel>], iteration_bounds = array<i64: 2, 1>, scalar_prefetch = 0 : i64, scratch_operands = 1 : i64, tpu.core_type = #tpu.core_type<tc>, window_params = [{transform_indices = @transform_0, window_bounds = array<i64: 1, 16, 8>}, {transform_indices = @transform_1, window_bounds = array<i64: 1, 16, 8>}]} {
    %c0 = arith.constant 0 : index
    %c0_0 = arith.constant 0 : index
    %c0_1 = arith.constant 0 : index
    %0 = vector.load %arg2[%c0, %c0_0, %c0_1] : memref<1x16x8xf32, #tpu.memory_space<vmem>>, vector<1x16x8xf32>
    %1 = vector.shape_cast %0 : vector<1x16x8xf32> to vector<16x8xf32>
    %c2 = arith.constant 2 : index
    %c0_2 = arith.constant 0 : index
    %2 = vector.load %arg4[%c2, %c0_2] : memref<20x8xf32, #tpu.memory_space<vmem>>, vector<16x8xf32>
    tpu.vector_store %arg4[%c2, %c0_2], %1 {strides = array<i32>} : memref<20x8xf32, #tpu.memory_space<vmem>>, vector<16x8xf32>,
    %3 = vector.extract_strided_slice %1 {offsets = [0, 0], sizes = [1, 8], strides = [1, 1]} : vector<16x8xf32> to vector<1x8xf32>
    %4 = vector.shape_cast %3 : vector<1x8xf32> to vector<1x8xf32>
    %5 = vector.broadcast %4 : vector<1x8xf32> to vector<2x8xf32>
    %c0_3 = arith.constant 0 : index
    %c0_4 = arith.constant 0 : index
    %6 = vector.load %arg4[%c0_3, %c0_4] : memref<20x8xf32, #tpu.memory_space<vmem>>, vector<2x8xf32>
    tpu.vector_store %arg4[%c0_3, %c0_4], %5 {strides = array<i32>} : memref<20x8xf32, #tpu.memory_space<vmem>>, vector<2x8xf32>,
    %7 = vector.extract_strided_slice %1 {offsets = [15, 0], sizes = [1, 8], strides = [1, 1]} : vector<16x8xf32> to vector<1x8xf32>
    %8 = vector.shape_cast %7 : vector<1x8xf32> to vector<1x8xf32>
    %9 = vector.broadcast %8 : vector<1x8xf32> to vector<2x8xf32>
    %c18 = arith.constant 18 : index
    %c0_5 = arith.constant 0 : index
    %10 = vector.load %arg4[%c18, %c0_5] : memref<20x8xf32, #tpu.memory_space<vmem>>, vector<2x8xf32>
    tpu.vector_store %arg4[%c18, %c0_5], %9 {strides = array<i32>} : memref<20x8xf32, #tpu.memory_space<vmem>>, vector<2x8xf32>,
    %c0_6 = arith.constant 0 : index
    %c0_7 = arith.constant 0 : index
    %11 = tpu.strided_load %arg4[%c0_6, %c0_7] {strides = array<i32: 2, 1>} : memref<20x8xf32, #tpu.memory_space<vmem>>, vector<8x8xf32>
    %c1 = arith.constant 1 : index
    %c0_8 = arith.constant 0 : index
    %12 = tpu.strided_load %arg4[%c1, %c0_8] {strides = array<i32: 2, 1>} : memref<20x8xf32, #tpu.memory_space<vmem>>, vector<8x8xf32>
    %13 = arith.addf %11, %12 : vector<8x8xf32>
    %c2_9 = arith.constant 2 : index
    %c0_10 = arith.constant 0 : index
    %14 = tpu.strided_load %arg4[%c2_9, %c0_10] {strides = array<i32: 2, 1>} : memref<20x8xf32, #tpu.memory_space<vmem>>, vector<8x8xf32>
    %15 = arith.addf %13, %14 : vector<8x8xf32>
    %c3 = arith.constant 3 : index
    %c0_11 = arith.constant 0 : index
    %16 = tpu.strided_load %arg4[%c3, %c0_11] {strides = array<i32: 2, 1>} : memref<20x8xf32, #tpu.memory_space<vmem>>, vector<8x8xf32>
    %17 = arith.addf %15, %16 : vector<8x8xf32>
    %c4 = arith.constant 4 : index
    %c0_12 = arith.constant 0 : index
    %18 = tpu.strided_load %arg4[%c4, %c0_12] {strides = array<i32: 2, 1>} : memref<20x8xf32, #tpu.memory_space<vmem>>, vector<8x8xf32>
    %19 = arith.addf %17, %18 : vector<8x8xf32>
    %cst = arith.constant 2.000000e-01 : f32
    %20 = vector.broadcast %cst : f32 to vector<8x8xf32>
    %21 = arith.mulf %19, %20 : vector<8x8xf32>
    %22 = vector.shape_cast %21 : vector<8x8xf32> to vector<8x1x8xf32>
    %23 = vector.shape_cast %22 : vector<8x1x8xf32> to vector<8x1x8xf32>
    %24 = vector.broadcast %23 : vector<8x1x8xf32> to vector<8x2x8xf32>
    %25 = vector.shape_cast %24 : vector<8x2x8xf32> to vector<16x8xf32>
    %c0_13 = arith.constant 0 : index
    %c0_14 = arith.constant 0 : index
    %c0_15 = arith.constant 0 : index
    %26 = vector.load %arg3[%c0_13, %c0_14, %c0_15] : memref<1x16x8xf32, #tpu.memory_space<vmem>>, vector<1x16x8xf32>
    %27 = vector.shape_cast %26 : vector<1x16x8xf32> to vector<16x8xf32>
    %28 = vector.shape_cast %25 : vector<16x8xf32> to vector<1x16x8xf32>
    tpu.vector_store %arg3[%c0_13, %c0_14, %c0_15], %28 {strides = array<i32>} : memref<1x16x8xf32, #tpu.memory_space<vmem>>, vector<1x16x8xf32>,
    return
  }
  func.func @transform_0(%arg0: i32, %arg1: i32) -> (i32, i32, i32) {
    %c0_i32 = arith.constant 0 : i32
    %c0_i32_0 = arith.constant 0 : i32
    return %arg0, %c0_i32, %arg1 : i32, i32, i32
  }
  func.func @transform_1(%arg0: i32, %arg1: i32) -> (i32, i32, i32) {
    %c0_i32 = arith.constant 0 : i32
    %c0_i32_0 = arith.constant 0 : i32
    return %arg0, %c0_i32, %arg1 : i32, i32, i32
  }
}

</mosaic_0001>

<bundles_post_ra>
// kernel: tpu_custom_call.1
= control target key start
LH: loop header
LB: loop body
LE: loop exit
PB: predicated region body
PF: predicated region fallthrough
CT: control target
= control target key end

     0   :  { %s456_s6 = smov 0   ;;  %s458_s7 = smov 0   ;;  %s500_s0 = inlined_call_operand.vmem [shape: f32[2,16,8], index: 0, kind: input, shape index: {}]   ;;  %s501_s1 = inlined_call_operand.vmem [shape: f32[2,16,8], index: 1, kind: output, shape index: {}]  }
   0x1   :  { %s460_s8 = smov 0  }
   0x2 LB: > { %s23_s9 = sadd.s32 1, %s438_s7  ;;  %p385_p0 = scmp.ge.s32.totalorder %s442_s8, 1  ;;  %s442_s8 = sphi %s460_s8, %s11_s8   ;;  %s438_s7 = sphi %s458_s7, %s503_s7   ;;  %s434_s6 = sphi %s456_s6, %s502_s6  }
   0x3   : > { %p25_p1 = scmp.ge.s32.totalorder %s23_s9, 2  ;;  %p106_p2 = scmp.lt.s32.totalorder %s442_s8, 3 }
   0x5   : > { %s505_s9 = smov (%p25_p1, %s23_s9), 0  ;;  %p107_p3 = pnand %p385_p0, %p106_p2 }
   0x6   : > { %p132_p4 = scmp.lt.s32.totalorder (!%p107_p3), %s434_s6, 1  ;;  %v153_v0 = vlaneseq (!%p107_p3)  ;;  %vm150_vm0 = vcmask (!%p107_p3), 64512   ;;  %vm157_vm1 = vcmask (!%p107_p3), 58368   ;;  %v444_v8 = vmov (!%p107_p3), 1966171168  }
   0x7   : > { %110 = sbr.rel (%p107_p3) target bundleno = 57 (0x39), region = 24  ;;  %v181_v9 = vunpack.c.l.s4 (!%p107_p3), %v444_v8  ;;  %v445_v22 = vmov (!%p107_p3), 1983009808  }
   0x8   : > { %v154_v1 = vshrl.u32 (!%p107_p3), %v153_v0, 7  ;;  %v263_v23 = vunpack.c.l.s4 (!%p107_p3), %v445_v22 }
   0x9   : > { %v182_v15 = vunpack.c.0.s8 (!%p107_p3), %v181_v9 }
   0xa   : > { %v155_v2 = vsub.s32 (!%p107_p3), 0, %v154_v1  ;;  %v161_v3 = vsub.s32 (!%p107_p3), 7, %v154_v1  ;;  %v264_v29 = vunpack.c.0.s8 (!%p107_p3), %v263_v23 }
   0xb   : > { %v185_v20 = vsub.s32 (!%p107_p3), %v182_v15, %v154_v1 }
   0xc   : > { %v267_v39 = vsub.s32 (!%p107_p3), %v264_v29, %v154_v1 }
   0xe   : > { %s507_s6 = smov (!%p132_p4, %s434_s6), 1 }
   0xf   : > { %s392_s10 = sshll.u32 %s507_s6, 4 }
  0x10   : > { %s139_s13 = scalar_lea.vmem %s500_s0, %s392_s10  ;;  %s147_s16 = scalar_lea.vmem %s501_s1, %s392_s10 }
  0x11   : > { %v148_v4 = vld [vmem:[%s139_s13] sm:$0xff]  ;;  %v149_v5 = vld [vmem:[%s139_s13 + $0x8] sm:$0xff] }
  0x12   : > { %151 = vst.msk [vmem:[#allocation2 + $0x2] sm:$0xff] %vm150_vm0, %v148_v4  ;;  %152 = vst.msk [vmem:[#allocation2 + $0xa] sm:$0xff] %vm150_vm0, %v149_v5  ;;  %v156_v6 = vrot.slane %v148_v4, %v155_v2  ;;  %v162_v7 = vrot.slane %v149_v5, %v161_v3 }
  0x14   : > { %158 = vst.msk [vmem:[#allocation2] sm:$0x3] %vm157_vm1, %v156_v6  ;;  %163 = vst.msk [vmem:[#allocation2 + $0x12] sm:$0x3] %vm157_vm1, %v162_v7 }
  0x19   : > { %v169_v13 = vld [vmem:[#allocation2 + $0x2] ss:$2 sm:$0xff]  ;;  %v172_v16 = vld [vmem:[#allocation2 + $0x3] ss:$2 sm:$0xff] }
  0x1b   : > { %v164_v10 = vld [vmem:[#allocation2] ss:$2 sm:$0xff]  ;;  %v166_v11 = vld [vmem:[#allocation2 + $0x1] ss:$2 sm:$0xff] }
  0x1c   : > { %v167_v12 = vadd.f32 %v166_v11, %v164_v10  ;;  %v175_v18 = vld [vmem:[#allocation2 + $0x4] ss:$2 sm:$0xff] }
  0x1e   : > { %v170_v14 = vadd.f32 %v169_v13, %v167_v12 }
  0x20   : > { %v173_v17 = vadd.f32 %v172_v16, %v170_v14 }
  0x22   : > { %v176_v19 = vadd.f32 %v175_v18, %v173_v17 }
  0x24   : > { %v177_v21 = vmul.f32 0.2, %v176_v19 }
  0x26   : > { %v186_v24 = vrot.slane %v177_v21, %v185_v20  ;;  %v179_v25 = vcombine.high %v177_v21, %v177_v21 }
  0x28   : > { %v194_v26 = vcombine.high %v186_v24, %v186_v24  ;;  %v202_v27 = vrot.slane %v186_v24, %v185_v20  ;;  %v193_v28 = vrot.slane %v179_v25, %v185_v20 }
  0x2a   : > { %v216_v30 = vrot.slane %v194_v26, %v185_v20  ;;  %v224_v31 = vcombine.high %v202_v27, %v202_v27  ;;  %v195_v32 = vcombine.high %v193_v28, %v193_v28  ;;  %v209_v33 = vrot.slane %v193_v28, %v185_v20 }
  0x2b   : > { %v231_v35 = vrot.slane %v202_v27, %v155_v2 }
  0x2c   : > { %v226_v34 = vcombine.high %v216_v30, %v216_v30  ;;  %v235_v36 = vrot.slane %v216_v30, %v155_v2  ;;  %v223_v37 = vrot.slane %v195_v32, %v185_v20  ;;  %v239_v38 = vrot.slane %v224_v31, %v155_v2 }
  0x2d   : > { %v225_v40 = vcombine.high %v209_v33, %v209_v33  ;;  %v247_v41 = vrot.slane %v209_v33, %v155_v2 }
  0x2e   : > { %v243_v42 = vrot.slane %v226_v34, %v155_v2  ;;  %v260_v43 = vcombine.low %v231_v35, %v235_v36  ;;  %v227_v44 = vcombine.high %v223_v37, %v223_v37  ;;  %v251_v45 = vrot.slane %v223_v37, %v155_v2 }
  0x2f   : > { %v255_v47 = vrot.slane %v225_v40, %v155_v2 }
  0x30   : > { %v261_v46 = vcombine.low %v239_v38, %v243_v42  ;;  %v259_v48 = vrot.slane %v227_v44, %v155_v2  ;;  %v277_v49 = vcombine.low %v247_v41, %v251_v45  ;;  %v268_v50 = vrot.slane %v260_v43, %v267_v39 }
  0x32   : > { %v275_v51 = vrot.slane %v261_v46, %v267_v39  ;;  %v278_v52 = vcombine.low %v255_v47, %v259_v48  ;;  %v285_v54 = vrot.slane %v277_v49, %v267_v39 }
  0x34   : > { %v276_v53 = vcombine.low %v268_v50, %v275_v51  ;;  %v292_v55 = vrot.slane %v278_v52, %v267_v39 }
  0x36   : > { %296 = vst.msk [vmem:[%s147_s16] sm:$0xff] %vm150_vm0, %v276_v53  ;;  %v293_v56 = vcombine.low %v285_v54, %v292_v55 }
  0x38   : > { %297 = vst.msk [vmem:[%s147_s16 + $0x8] sm:$0xff] %vm150_vm0, %v293_v56 }
  0x39 PF: > { %s11_s8 = sadd.s32 1, %s442_s8   ;;  %s502_s6 = smov %s438_s7 }
  0x3a   : > { %p8_p5 = scmp.ge.s32.totalorder %s11_s8, 4   ;;  %s503_s7 = smov %s505_s9 }
  0x3c   :  { %10 = sbr.rel (!%p8_p5) target bundleno = 2 (0x2), region = 58 }

</bundles_post_ra>
